<compile_context>
chip_gen: v7x
topology: tpu7x:2x2x1
jax: 0.10.0
libtpu: 0.0.40
codegen_flags: <defaults>
</compile_context>

<pallas_src>
import functools
import math

import jax
import jax.numpy as jnp
import numpy as np
from jax.experimental import pallas as pl
from jax.experimental.pallas import tpu as pltpu

FROM_GRAY_CH = {4: 512, 8: 256, 16: 128, 32: 64, 64: 32, 128: 16, 256: 8}
PROG_CH = {8: (256, 512), 16: (128, 256), 32: (64, 128),
           64: (32, 64), 128: (16, 32), 256: (8, 16)}


# ----------------------------- Pallas kernels ------------------------------

def conv_pool_kernel(xpad_ref, w_ref, b_ref, o_ref, acc_ref, *, TH, pixel_norm):
    """EqualConv2d(3x3, pad 1) + PixelNorm + LeakyReLU(0.2) + 2x2 avg-pool.

    xpad_ref: (1, H+2, W+2, Cin)  whole padded image of one batch element
    w_ref:    (9*Cin, Cout)       rows ordered (ky, kx, cin)
    b_ref:    (1, Cout)
    o_ref:    (1, TH//2, W//2, Cout)  pooled output row tile
    acc_ref:  (TH*W, Cout) f32 VMEM scratch accumulator
    """
    _, Hp, Wp, Cin = xpad_ref.shape
    W = Wp - 2
    Cout = w_ref.shape[1]
    t = pl.program_id(1)
    row0 = pl.multiple_of(t * TH, TH)

    for dy in range(3):
        # Fold the three dx taps into the K dimension: one matmul with K=3*Cin.
        parts = [xpad_ref[0, pl.ds(row0 + dy, TH), dx:dx + W, :]
                 for dx in range(3)]
        patch = jnp.concatenate(parts, axis=-1).reshape(TH * W, 3 * Cin)
        prod = jnp.dot(patch, w_ref[dy * 3 * Cin:(dy + 1) * 3 * Cin, :],
                       preferred_element_type=jnp.float32)
        if dy == 0:
            acc_ref[...] = prod
        else:
            acc_ref[...] += prod

    acc = acc_ref[...] + b_ref[...]
    if pixel_norm:
        acc = acc * jax.lax.rsqrt(
            jnp.mean(acc * acc, axis=-1, keepdims=True) + 1e-8)
    acc = jnp.where(acc >= 0.0, acc, 0.2 * acc)          # LeakyReLU(0.2)

    # fused 2x2 average pool (VPU-only, rides under the MXU epilogue)
    a = acc.reshape(TH // 2, 2, W, Cout)
    s = a[:, 0] + a[:, 1]
    a = s.reshape(TH // 2, W // 2, 2, Cout)
    o_ref[0] = 0.25 * (a[:, :, 0] + a[:, :, 1])


def from_gray_kernel(x_ref, w_ref, b_ref, o_ref):
    # 1x1 conv with tiny Cin (in_ch, typically 1): pure VPU outer product,
    # no MXU, no zero-padding of the activation K dimension.
    _, TH, W, Cin = x_ref.shape
    Cout = w_ref.shape[1]
    x = x_ref[0].reshape(TH * W, Cin)
    out = b_ref[...] + x[:, 0:1] * w_ref[0:1, :]
    for i in range(1, Cin):
        out = out + x[:, i:i + 1] * w_ref[i:i + 1, :]
    o_ref[0] = out.reshape(TH, W, Cout)


def smooth_kernel(x_ref, w_ref, b_ref, y_ref, alpha_ref, o_ref):
    # Fused fade-in skip path:  (1-a)*from_gray(avg_pool2(x)) + a*y
    # x_ref: (1, 2*TH2, W, Cin) full-res gray tile; y_ref/o_ref: (1, TH2, W//2, Cout)
    # alpha_ref: (1,) f32 in SMEM (no recompile per alpha value).
    _, TH2x2, W, Cin = x_ref.shape
    TH2 = TH2x2 // 2
    W2 = W // 2
    Cout = w_ref.shape[1]
    alpha = alpha_ref[0]

    x = x_ref[0]                               # (2*TH2, W, Cin)
    a = x.reshape(TH2, 2, W, Cin)
    s = a[:, 0] + a[:, 1]
    a = s.reshape(TH2, W2, 2, Cin)
    xp = 0.25 * (a[:, :, 0] + a[:, :, 1])      # pooled (TH2, W2, Cin)
    xp = xp.reshape(TH2 * W2, Cin)

    skip = b_ref[...] + xp[:, 0:1] * w_ref[0:1, :]
    for i in range(1, Cin):
        skip = skip + xp[:, i:i + 1] * w_ref[i:i + 1, :]
    skip = skip.reshape(TH2, W2, Cout)

    o_ref[0] = (1.0 - alpha) * skip + alpha * y_ref[0]


def linear_kernel(x_ref, w_ref, b_ref, o_ref, acc_ref):
    # K-tiled (M,K)@(K,N)+b with a VMEM accumulator.
    k = pl.program_id(0)

    @pl.when(k == 0)
    def _():
        acc_ref[...] = jnp.zeros_like(acc_ref)

    acc_ref[...] += jnp.dot(x_ref[...], w_ref[...],
                            preferred_element_type=jnp.float32)

    @pl.when(k == pl.num_programs(0) - 1)
    def _():
        o_ref[...] = acc_ref[...] + b_ref[...]


# ----------------------------- Pallas wrappers ------------------------------

def pallas_conv_pool(x, w9, b, pixel_norm=True):
    """ConvBlock(3x3) + fused 2x2 avg-pool.  x: (B,H,W,Cin) -> (B,H/2,W/2,Cout)."""
    B, H, W, Cin = x.shape
    Cout = w9.shape[-1]
    TH = min(H, 16)                     # row tile of the pre-pool output
    T = H // TH
    # TODO(synk): halo padding is still a wrapper-side jnp.pad (one extra HBM
    # copy per level); in-kernel halo construction left for a later pass.
    xpad = jnp.pad(x, ((0, 0), (1, 1), (1, 1), (0, 0)))
    kern = functools.partial(conv_pool_kernel, TH=TH, pixel_norm=pixel_norm)
    return pl.pallas_call(
        kern,
        out_shape=jax.ShapeDtypeStruct((B, H // 2, W // 2, Cout), jnp.float32),
        grid=(B, T),
        in_specs=[pl.BlockSpec((1, H + 2, W + 2, Cin),
                               lambda bi, t: (bi, 0, 0, 0)),
                  pl.BlockSpec((9 * Cin, Cout), lambda bi, t: (0, 0)),
                  pl.BlockSpec((1, Cout), lambda bi, t: (0, 0))],
        out_specs=pl.BlockSpec((1, TH // 2, W // 2, Cout),
                               lambda bi, t: (bi, t, 0, 0)),
        scratch_shapes=[pltpu.VMEM((TH * W, Cout), jnp.float32)],
        compiler_params=pltpu.CompilerParams(
            dimension_semantics=("parallel", "parallel"),
            vmem_limit_bytes=48 << 20),
    )(xpad, w9.reshape(9 * Cin, Cout), b.reshape(1, Cout))


def pallas_from_gray(x, w, b):
    """1x1 conv.  x: (B,H,W,Cin) -> (B,H,W,Cout)."""
    B, H, W, Cin = x.shape
    Cout = w.shape[1]
    TH = min(H, 8)
    T = H // TH
    return pl.pallas_call(
        from_gray_kernel,
        out_shape=jax.ShapeDtypeStruct((B, H, W, Cout), jnp.float32),
        grid=(B, T),
        in_specs=[pl.BlockSpec((1, TH, W, Cin), lambda bi, t: (bi, t, 0, 0)),
                  pl.BlockSpec((Cin, Cout), lambda bi, t: (0, 0)),
                  pl.BlockSpec((1, Cout), lambda bi, t: (0, 0))],
        out_specs=pl.BlockSpec((1, TH, W, Cout), lambda bi, t: (bi, t, 0, 0)),
        compiler_params=pltpu.CompilerParams(
            dimension_semantics=("parallel", "parallel")),
    )(x, w, b.reshape(1, Cout))


def pallas_smooth(x, w, b, y, alpha):
    """(1-alpha)*from_gray(avg_pool2(x)) + alpha*y, fused.  y: (B,H/2,W/2,Cout)."""
    B, H, W, Cin = x.shape
    Cout = w.shape[1]
    H2, W2 = H // 2, W // 2
    TH2 = min(H2, 8)
    T = H2 // TH2
    alpha_arr = jnp.full((1,), alpha, jnp.float32)
    return pl.pallas_call(
        smooth_kernel,
        out_shape=jax.ShapeDtypeStruct((B, H2, W2, Cout), jnp.float32),
        grid=(B, T),
        in_specs=[pl.BlockSpec((1, 2 * TH2, W, Cin),
                               lambda bi, t: (bi, t, 0, 0)),
                  pl.BlockSpec((Cin, Cout), lambda bi, t: (0, 0)),
                  pl.BlockSpec((1, Cout), lambda bi, t: (0, 0)),
                  pl.BlockSpec((1, TH2, W2, Cout), lambda bi, t: (bi, t, 0, 0)),
                  pl.BlockSpec(memory_space=pltpu.MemorySpace.SMEM)],
        out_specs=pl.BlockSpec((1, TH2, W2, Cout), lambda bi, t: (bi, t, 0, 0)),
        compiler_params=pltpu.CompilerParams(
            dimension_semantics=("parallel", "parallel")),
    )(x, w, b.reshape(1, Cout), y, alpha_arr)


def pallas_linear(x2d, w, b):
    M, K = x2d.shape
    N = w.shape[1]
    TK = 2048 if K % 2048 == 0 else K
    nk = K // TK
    return pl.pallas_call(
        linear_kernel,
        out_shape=jax.ShapeDtypeStruct((M, N), jnp.float32),
        grid=(nk,),
        in_specs=[pl.BlockSpec((M, TK), lambda k: (0, k)),
                  pl.BlockSpec((TK, N), lambda k: (k, 0)),
                  pl.BlockSpec((1, N), lambda k: (0, 0))],
        out_specs=pl.BlockSpec((M, N), lambda k: (0, 0)),
        scratch_shapes=[pltpu.VMEM((M, N), jnp.float32)],
        compiler_params=pltpu.CompilerParams(
            dimension_semantics=("arbitrary",)),
    )(x2d, w, b.reshape(1, N))


PALLAS_OPS = dict(from_gray=pallas_from_gray, conv_pool=pallas_conv_pool,
                  smooth=pallas_smooth, linear=pallas_linear)


# ----------------------------- plain-JAX reference ------------------------------

def ref_from_gray(x, w, b):
    return jnp.einsum('bhwi,io->bhwo', x, w,
                      precision=jax.lax.Precision.HIGHEST) + b


def ref_pool(x):
    B, H, W, C = x.shape
    return x.reshape(B, H // 2, 2, W // 2, 2, C).mean(axis=(2, 4))


def ref_conv_pool(x, w9, b, pixel_norm=True):
    Cin, Cout = w9.shape[1], w9.shape[2]
    w = w9.reshape(3, 3, Cin, Cout)
    out = jax.lax.conv_general_dilated(
        x, w, window_strides=(1, 1), padding=((1, 1), (1, 1)),
        dimension_numbers=('NHWC', 'HWIO', 'NHWC'),
        precision=jax.lax.Precision.HIGHEST)
    out = out + b
    if pixel_norm:
        out = out / jnp.sqrt(jnp.mean(out ** 2, axis=-1, keepdims=True) + 1e-8)
    out = jnp.where(out >= 0.0, out, 0.2 * out)
    return ref_pool(out)


def ref_smooth(x, w, b, y, alpha):
    skip = ref_from_gray(ref_pool(x), w, b)
    return (1.0 - alpha) * skip + alpha * y


def ref_linear(x2d, w, b):
    return jnp.dot(x2d, w, precision=jax.lax.Precision.HIGHEST) + b


REF_OPS = dict(from_gray=ref_from_gray, conv_pool=ref_conv_pool,
               smooth=ref_smooth, linear=ref_linear)


# ----------------------------- Encoder forward ------------------------------

def init_params(key, code_dim=128, in_ch=1):
    params = {'from_gray': {}, 'prog': {}}
    for res, c in FROM_GRAY_CH.items():
        key, k1, k2 = jax.random.split(key, 3)
        w = jax.random.normal(k1, (in_ch, c), jnp.float32) / math.sqrt(in_ch)
        bia = jax.random.normal(k2, (c,), jnp.float32) * 0.01
        params['from_gray'][res] = (w, bia)
    for res, (ci, co) in PROG_CH.items():
        key, k1 = jax.random.split(key)
        w_orig = jax.random.normal(k1, (3, 3, ci, co), jnp.float32)   # normal_()
        scale = math.sqrt(2.0 / (ci * 9))                             # EqualLR
        params['prog'][res] = ((w_orig * scale).reshape(9, ci, co),
                               jnp.zeros((co,), jnp.float32))         # bias zero
    key, k1, k2 = jax.random.split(key, 3)
    wl = jax.random.normal(k1, (8192, code_dim), jnp.float32) / math.sqrt(8192.0)
    bl = jax.random.normal(k2, (code_dim,), jnp.float32) * 0.01
    params['linear'] = (wl, bl)
    return params


def forward(x_nchw, params, step, alpha, ops):
    """Mirrors Encoder.forward.  x_nchw: (B, in_ch, 4*2**step, 4*2**step)."""
    B = x_nchw.shape[0]
    step = min(step, 6)
    x = jnp.transpose(x_nchw, (0, 2, 3, 1))                  # NCHW -> NHWC
    wl, bl = params['linear']
    if step == 0:
        wg, bg = params['from_gray'][4]
        out4 = ops['from_gray'](x, wg, bg)
        out4_flat = jnp.transpose(out4, (0, 3, 1, 2)).reshape(B, -1)
        return [ops['linear'](out4_flat, wl, bl)]
    results = []
    wg, bg = params['from_gray'][4 * 2 ** step]
    out = ops['from_gray'](x, wg, bg)
    for k in range(step, 0, -1):
        r = 4 * 2 ** k
        wc, bc = params['prog'][r]
        out = ops['conv_pool'](out, wc, bc, pixel_norm=True)  # conv + avg_pool2
        if k == step and 0.0 <= alpha < 1.0:                  # smooth_input()
            wg2, bg2 = params['from_gray'][4 * 2 ** (step - 1)]
            out = ops['smooth'](x, wg2, bg2, out, alpha)
        if k > 1:
            results.append(jnp.transpose(out, (0, 3, 1, 2)))  # back to NCHW
    out4_flat = jnp.transpose(out, (0, 3, 1, 2)).reshape(B, -1)  # torch .view order
    results.append(out4_flat)
    results.append(ops['linear'](out4_flat, wl, bl))
    return results


# ----------------------------- demo ------------------------------

if __name__ == "__main__":
    key = jax.random.PRNGKey(0)
    kp, kx = jax.random.split(key)
    params = init_params(kp, code_dim=128, in_ch=1)

    step, alpha = 2, 0.5                        # 16x16 grayscale input
    res = 4 * 2 ** step
    x = jax.random.normal(kx, (2, 1, res, res), jnp.float32)

    outs = forward(x, params, step, alpha, PALLAS_OPS)
    outs = jax.block_until_ready(outs)

    refs = forward(x, params, step, alpha, REF_OPS)
    for o, r in zip(outs, refs):
        np.testing.assert_allclose(np.asarray(o), np.asarray(r),
                                   rtol=1e-2, atol=1e-2)
    print("KERNEL_OK")
</pallas_src>

<mosaic_0001>
module attributes {stable_mosaic.version = 11 : i64} {
  func.func @from_gray_kernel(%arg0: i32, %arg1: i32, %arg2: memref<1x8x16x1xf32, #tpu.memory_space<vmem>>, %arg3: memref<1x128xf32, #tpu.memory_space<vmem>>, %arg4: memref<1x128xf32, #tpu.memory_space<vmem>>, %arg5: memref<1x8x16x128xf32, #tpu.memory_space<vmem>>) attributes {dimension_semantics = [#tpu.dimension_semantics<parallel>, #tpu.dimension_semantics<parallel>], iteration_bounds = array<i64: 2, 2>, scalar_prefetch = 0 : i64, scratch_operands = 0 : i64, tpu.core_type = #tpu.core_type<tc>, window_params = [{transform_indices = @transform_0, window_bounds = array<i64: 1, 8, 16, 1>}, {pipeline_mode = #tpu.pipeline_mode<synchronous>, transform_indices = @transform_1, window_bounds = array<i64: 1, 128>}, {pipeline_mode = #tpu.pipeline_mode<synchronous>, transform_indices = @transform_2, window_bounds = array<i64: 1, 128>}, {transform_indices = @transform_3, window_bounds = array<i64: 1, 8, 16, 128>}]} {
    %c0 = arith.constant 0 : index
    %c0_0 = arith.constant 0 : index
    %c0_1 = arith.constant 0 : index
    %c0_2 = arith.constant 0 : index
    %0 = vector.load %arg2[%c0, %c0_0, %c0_1, %c0_2] : memref<1x8x16x1xf32, #tpu.memory_space<vmem>>, vector<1x8x16x1xf32>
    %1 = vector.shape_cast %0 : vector<1x8x16x1xf32> to vector<8x16x1xf32>
    %2 = vector.shape_cast %1 : vector<8x16x1xf32> to vector<128x1xf32>
    %c0_3 = arith.constant 0 : index
    %c0_4 = arith.constant 0 : index
    %3 = vector.load %arg4[%c0_3, %c0_4] : memref<1x128xf32, #tpu.memory_space<vmem>>, vector<1x128xf32>
    %c0_5 = arith.constant 0 : index
    %c0_6 = arith.constant 0 : index
    %4 = vector.load %arg3[%c0_5, %c0_6] : memref<1x128xf32, #tpu.memory_space<vmem>>, vector<1x128xf32>
    %5 = vector.broadcast %2 : vector<128x1xf32> to vector<128x128xf32>
    %6 = vector.broadcast %4 : vector<1x128xf32> to vector<128x128xf32>
    %7 = arith.mulf %5, %6 : vector<128x128xf32>
    %8 = vector.broadcast %3 : vector<1x128xf32> to vector<128x128xf32>
    %9 = arith.addf %8, %7 : vector<128x128xf32>
    %10 = vector.shape_cast %9 : vector<128x128xf32> to vector<8x16x128xf32>
    %c0_7 = arith.constant 0 : index
    %c0_8 = arith.constant 0 : index
    %c0_9 = arith.constant 0 : index
    %c0_10 = arith.constant 0 : index
    %11 = vector.load %arg5[%c0_7, %c0_8, %c0_9, %c0_10] : memref<1x8x16x128xf32, #tpu.memory_space<vmem>>, vector<1x8x16x128xf32>
    %12 = vector.shape_cast %11 : vector<1x8x16x128xf32> to vector<8x16x128xf32>
    %13 = vector.shape_cast %10 : vector<8x16x128xf32> to vector<1x8x16x128xf32>
    tpu.vector_store %arg5[%c0_7, %c0_8, %c0_9, %c0_10], %13 {strides = array<i32>} : memref<1x8x16x128xf32, #tpu.memory_space<vmem>>, vector<1x8x16x128xf32>,
    return
  }
  func.func @transform_0(%arg0: i32, %arg1: i32) -> (i32, i32, i32, i32) {
    %c0_i32 = arith.constant 0 : i32
    %c0_i32_0 = arith.constant 0 : i32
    %c0_i32_1 = arith.constant 0 : i32
    return %arg0, %arg1, %c0_i32, %c0_i32_0 : i32, i32, i32, i32
  }
  func.func @transform_1(%arg0: i32, %arg1: i32) -> (i32, i32) {
    %c0_i32 = arith.constant 0 : i32
    %c0_i32_0 = arith.constant 0 : i32
    %c0_i32_1 = arith.constant 0 : i32
    return %c0_i32, %c0_i32_0 : i32, i32
  }
  func.func @transform_2(%arg0: i32, %arg1: i32) -> (i32, i32) {
    %c0_i32 = arith.constant 0 : i32
    %c0_i32_0 = arith.constant 0 : i32
    %c0_i32_1 = arith.constant 0 : i32
    return %c0_i32, %c0_i32_0 : i32, i32
  }
  func.func @transform_3(%arg0: i32, %arg1: i32) -> (i32, i32, i32, i32) {
    %c0_i32 = arith.constant 0 : i32
    %c0_i32_0 = arith.constant 0 : i32
    %c0_i32_1 = arith.constant 0 : i32
    return %arg0, %arg1, %c0_i32, %c0_i32_0 : i32, i32, i32, i32
  }
}

</mosaic_0001>

<bundles_post_ra>
// kernel: tpu_custom_call.1
= control target key start
LH: loop header
LB: loop body
LE: loop exit
PB: predicated region body
PF: predicated region fallthrough
CT: control target
= control target key end

     0   :  { %8 = vsyncpa [#allocation3], 0  ;;  %s883_s0 = inlined_call_operand.vmem [shape: f32[2,16,16,1], index: 0, kind: input, shape index: {}]   ;;  %s884_s1 = inlined_call_operand.vmem [shape: f32[1,128], index: 1, kind: input, shape index: {}]   ;;  %s885_s2 = inlined_call_operand.vmem [shape: f32[1,128], index: 2, kind: input, shape index: {}]   ;;  %s886_s3 = inlined_call_operand.hbm [shape: f32[2,16,16,128], index: 3, kind: output, shape index: {}]  }
   0x1   :  { %10 = vsyncpa [#allocation3 + $0x1], 0  ;;  %s679_s12 = smov 0   ;;  %s681_s13 = smov 0  }
   0x2   :  { %s683_s14 = smov 0   ;;  %s685_s15 = smov 0  }
   0x3   :  { %s687_s16 = smov 0   ;;  %s689_s17 = smov 0  }
   0x4   :  { %s691_s18 = smov 0   ;;  %s693_s19 = smov 0  }
   0x5 LB: > { %s463_s20 = sadd.s32 4294967295, %s653_s19   ;;  %s464_s21 = sadd.s32 4294967294, %s653_s19   ;;  %s653_s19 = sphi %s693_s19, %s16_s19   ;;  %s649_s18 = sphi %s691_s18, %s895_s18   ;;  %s645_s17 = sphi %s689_s17, %s894_s17   ;;  %s641_s16 = sphi %s687_s16, %s893_s16   ;;  %s637_s15 = sphi %s685_s15, %s892_s15   ;;  %s633_s14 = sphi %s683_s14, %s891_s14   ;;  %s629_s13 = sphi %s681_s13, %s890_s13   ;;  %s625_s12 = sphi %s679_s12, %s889_s12  }
   0x6   : > { %s25_s22 = sadd.s32 1, %s645_s17  ;;  %s28_s23 = sadd.s32 1, %s649_s18 }
   0x7   : > { %p26_p0 = scmp.ge.s32.totalorder %s25_s22, 2  ;;  %p117_p1 = scmp.ne.s32.totalorder %s633_s14, %s629_s13 }
   0x8   : > { %p118_p2 = scmp.eq.s32.totalorder %s463_s20, 3  ;;  %p123_p5 = scmp.ne.s32.totalorder %s629_s13, %s625_s12 }
   0x9   : > { %s897_s22 = smov (%p26_p0, %s25_s22), 0  ;;  %s899_s23 = smov (!%p26_p0, %s28_s23), %s649_s18 }
   0xa   : > { %s103_s24 = ssub.s32 %s645_s17, %s897_s22  ;;  %p730_p3 = por %p118_p2, %p117_p1 }
   0xb   : > { %p30_p4 = scmp.ge.s32.totalorder %s899_s23, 2  ;;  %p124_p6 = scmp.eq.s32.totalorder %s464_s21, 3 }
   0xc   : > { %p467_p7 = scmp.ge.s32.totalorder %s653_s19, 1  ;;  %p162_p9 = scmp.lt.s32.totalorder %s653_s19, 5 }
   0xd   : > { %s901_s23 = smov (%p30_p4, %s899_s23), 0  ;;  %p739_p8 = por %p124_p6, %p123_p5 }
   0xe   : > { %s102_s27 = ssub.s32 %s649_s18, %s901_s23  ;;  %s107_s28 = sadd.s32 1, %s633_s14 }
   0xf   : > { %s104_s29 = sor.u32 %s103_s24, %s102_s27  ;;  %p163_p10 = pnand %p467_p7, %p162_p9 }
  0x10   : > { %p105_p11 = scmp.eq.s32.totalorder %s104_s29, 0  ;;  %s469_s4 = sshll.u32 (!%p163_p10), %s637_s15, 3  ;;  %v655_v0 = vmov (!%p163_p10), 0   ;;  %v760_v17 = vld [vmem:[%s884_s1] ss:$0 sm:$0xff] (!%p163_p10) }
  0x11   : > { %166 = sbr.rel (%p163_p10) target bundleno = 206 (0xce), region = 32  ;;  %p192_p12 = scmp.lt.s32.totalorder (!%p163_p10), %s641_s16, 1  ;;  %558 = vset.pattern.permute.xlu1 (!%p163_p10), %v655_v0  ;;  %557 = vset.pattern.permute.xlu0 (!%p163_p10), %v655_v0  ;;  %v767_v18 = vld [vmem:[%s885_s2] ss:$0 sm:$0xff] (!%p163_p10) }
  0x12   : > { %s748_s30 = scalar_select %p105_p11, %s633_s14, %s107_s28  }
  0x13   : > { %p194_p13 = scmp.lt.s32.totalorder (!%p163_p10), %s469_s4, 15  ;;  %s188_s21 = sand.u32 (!%p163_p10), 1, %s629_s13  }
  0x14   : > { %s468_s28 = sshll.u32 (!%p163_p10), %s188_s21, 7  ;;  %s656_s27 = smov (!%p163_p10), [#allocation2]  }
  0x18   : > { %s193_s5 = scalar_select %p192_p12, %s641_s16, 1 }
  0x19   : > { %s903_s4 = smov (!%p194_p13, %s469_s4), 15 }
  0x1a   : > { %s471_s6 = sshll.u32 %s193_s5, 5  ;;  %s470_s7 = sshll.u32 %s903_s4, 1 }
  0x1b   : > { %s198_s8 = sadd.s32 %s471_s6, %s470_s7  ;;  %s773_s5 = scalar_lea.vmem [#allocation2], %s468_s28 }
  0x1c   : > { %s472_s9 = sshll.u32 %s198_s8, 3  ;;  %s482_s6 = sshll.u32 %s637_s15, 4 }
  0x1d   : > { %s200_s20 = scalar_lea.vmem %s883_s0, %s472_s9  ;;  %s478_s7 = sshll.u32 %s641_s16, 5 }
  0x1e   : > { %v205_v1 = vld [vmem:[%s200_s20 + $0x10] sm:$0xff]  ;;  %v203_v2 = vld [vmem:[%s200_s20] sm:$0xff]  ;;  %v206_v3 = vld [vmem:[%s200_s20 + $0x18] sm:$0xff]  ;;  %s375_s8 = sadd.s32 %s482_s6, %s478_s7  ;;  %s378_s16 = sshll.u32 %s773_s5, 4  ;;  %s823_s16 = int_to_ptr.vmem [resolvable:$true] %s378_s16 }
  0x1f   : > { %233 = vperm.xlu1 %558, %v205_v1   ;;  %223 = vperm.xlu0 %557, %v203_v2   ;;  %v204_v4 = vld [vmem:[%s200_s20 + $0x8] sm:$0xff]  ;;  %v207_v6 = vld [vmem:[%s200_s20 + $0x20] sm:$0xff]  ;;  %v210_v7 = vld [vmem:[%s200_s20 + $0x38] sm:$0xff]  ;;  %s479_s15 = sshll.u32 %s375_s8, 7  ;;  %s559_s24 = scalar_lea.vmem %s823_s16, 2048 }
  0x20   : > { %v208_v5 = vld [vmem:[%s200_s20 + $0x28] sm:$0xff]  ;;  %v209_v8 = vld [vmem:[%s200_s20 + $0x30] sm:$0xff]  ;;  %v211_v10 = vld [vmem:[%s200_s20 + $0x40] sm:$0xff]  ;;  %s821_s11 = scalar_lea.hbm %s886_s3, %s479_s15  ;;  %p560_p0 = scmp.ne.s32.totalorder %s823_s16, %s559_s24 }
  0x21   : > { %v212_v9 = vld [vmem:[%s200_s20 + $0x48] sm:$0xff]  ;;  %v214_v11 = vld [vmem:[%s200_s20 + $0x58] sm:$0xff]  ;;  %v213_v12 = vld [vmem:[%s200_s20 + $0x50] sm:$0xff]  ;;  %s563_s28 = sshll.u32 %s656_s27, 4  ;;  %s564_s28 = int_to_ptr.vmem [resolvable:$false] %s563_s28 }
  0x22   : > { %v216_v13 = vld [vmem:[%s200_s20 + $0x68] sm:$0xff]  ;;  %v215_v14 = vld [vmem:[%s200_s20 + $0x60] sm:$0xff]  ;;  %v218_v15 = vld [vmem:[%s200_s20 + $0x78] sm:$0xff]  ;;  %p561_p1 = pnand %p560_p0, %p730_p3  ;;  %s565_s29 = scalar_lea.vmem %s564_s28, 4096 }
  0x23   : > { %238 = vperm.xlu1 %558, %v206_v3   ;;  %228 = vperm.xlu0 %557, %v204_v4   ;;  %v217_v16 = vld [vmem:[%s200_s20 + $0x70] sm:$0xff]  ;;  %s831_s20 = scalar_lea.sflag [#allocation3], %s188_s21  ;;  %p566_p4 = scmp.lt.s32.totalorder %s823_s16, %s564_s28 }
  0x24   : > { %p562_p2 = pneg %p561_p1  ;;  %p567_p5 = scmp.lt.s32.totalorder %s565_s29, %s559_s24 }
  0x26   : > { %p568_p6 = por %p567_p5, %p566_p4 }
  0x27   : > { %248 = vperm.xlu1 %558, %v208_v5   ;;  %243 = vperm.xlu0 %557, %v207_v6  }
  0x28   : > { %p569_p7 = pnand %p568_p6, %p562_p2 }
  0x2b   : > { %258 = vperm.xlu1 %558, %v210_v7   ;;  %253 = vperm.xlu0 %557, %v209_v8  }
  0x2f   : > { %268 = vperm.xlu1 %558, %v212_v9   ;;  %263 = vperm.xlu0 %557, %v211_v10  }
  0x33   : > { %278 = vperm.xlu1 %558, %v214_v11   ;;  %273 = vperm.xlu0 %557, %v213_v12  }
  0x37   : > { %288 = vperm.xlu1 %558, %v216_v13   ;;  %283 = vperm.xlu0 %557, %v215_v14  }
  0x3b   : > { %298 = vperm.xlu1 %558, %v218_v15   ;;  %293 = vperm.xlu0 %557, %v217_v16  }
  0x9e   : > { %v234_v19 = vpop.permute.xlu1 %233  ;;  %v224_v20 = vpop.permute.xlu0 %223 }
  0x9f   : > { %v309_v21 = vmul.f32 %v760_v17, %v234_v19  ;;  %v307_v22 = vmul.f32 %v760_v17, %v224_v20 }
  0xa1   : > { %v331_v23 = vadd.f32 %v767_v18, %v309_v21  ;;  %v329_v24 = vadd.f32 %v767_v18, %v307_v22 }
  0xa2   : > { %v239_v25 = vpop.permute.xlu1 %238  ;;  %v229_v26 = vpop.permute.xlu0 %228 }
  0xa3   : > { %347 = vst [vmem:[%s773_s5 + $0x10] sm:$0xff] %v331_v23  ;;  %345 = vst [vmem:[%s773_s5] sm:$0xff] %v329_v24  ;;  %v310_v27 = vmul.f32 %v760_v17, %v239_v25  ;;  %v308_v28 = vmul.f32 %v760_v17, %v229_v26 }
  0xa5   : > { %v332_v29 = vadd.f32 %v767_v18, %v310_v27  ;;  %v330_v30 = vadd.f32 %v767_v18, %v308_v28 }
  0xa6   : > { %v249_v31 = vpop.permute.xlu1 %248  ;;  %v244_v32 = vpop.permute.xlu0 %243 }
  0xa7   : > { %348 = vst [vmem:[%s773_s5 + $0x18] sm:$0xff] %v332_v29  ;;  %346 = vst [vmem:[%s773_s5 + $0x8] sm:$0xff] %v330_v30  ;;  %v312_v33 = vmul.f32 %v760_v17, %v249_v31  ;;  %v311_v34 = vmul.f32 %v760_v17, %v244_v32 }
  0xa9   : > { %v334_v35 = vadd.f32 %v767_v18, %v312_v33  ;;  %v333_v36 = vadd.f32 %v767_v18, %v311_v34 }
  0xaa   : > { %v259_v37 = vpop.permute.xlu1 %258  ;;  %v254_v38 = vpop.permute.xlu0 %253 }
  0xab   : > { %350 = vst [vmem:[%s773_s5 + $0x28] sm:$0xff] %v334_v35  ;;  %349 = vst [vmem:[%s773_s5 + $0x20] sm:$0xff] %v333_v36  ;;  %v314_v39 = vmul.f32 %v760_v17, %v259_v37  ;;  %v313_v40 = vmul.f32 %v760_v17, %v254_v38 }
  0xad   : > { %v336_v41 = vadd.f32 %v767_v18, %v314_v39  ;;  %v335_v42 = vadd.f32 %v767_v18, %v313_v40 }
  0xae   : > { %v269_v43 = vpop.permute.xlu1 %268  ;;  %v264_v44 = vpop.permute.xlu0 %263 }
  0xaf   : > { %352 = vst [vmem:[%s773_s5 + $0x38] sm:$0xff] %v336_v41  ;;  %351 = vst [vmem:[%s773_s5 + $0x30] sm:$0xff] %v335_v42  ;;  %v316_v45 = vmul.f32 %v760_v17, %v269_v43  ;;  %v315_v46 = vmul.f32 %v760_v17, %v264_v44 }
  0xb1   : > { %v338_v47 = vadd.f32 %v767_v18, %v316_v45  ;;  %v337_v48 = vadd.f32 %v767_v18, %v315_v46 }
  0xb2   : > { %v279_v49 = vpop.permute.xlu1 %278  ;;  %v274_v50 = vpop.permute.xlu0 %273 }
  0xb3   : > { %354 = vst [vmem:[%s773_s5 + $0x48] sm:$0xff] %v338_v47  ;;  %353 = vst [vmem:[%s773_s5 + $0x40] sm:$0xff] %v337_v48  ;;  %v318_v51 = vmul.f32 %v760_v17, %v279_v49  ;;  %v317_v52 = vmul.f32 %v760_v17, %v274_v50 }
  0xb5   : > { %v340_v53 = vadd.f32 %v767_v18, %v318_v51  ;;  %v339_v54 = vadd.f32 %v767_v18, %v317_v52 }
  0xb6   : > { %v289_v55 = vpop.permute.xlu1 %288  ;;  %v284_v56 = vpop.permute.xlu0 %283 }
  0xb7   : > { %356 = vst [vmem:[%s773_s5 + $0x58] sm:$0xff] %v340_v53  ;;  %355 = vst [vmem:[%s773_s5 + $0x50] sm:$0xff] %v339_v54  ;;  %v320_v57 = vmul.f32 %v760_v17, %v289_v55  ;;  %v319_v58 = vmul.f32 %v760_v17, %v284_v56 }
  0xb9   : > { %v342_v59 = vadd.f32 %v767_v18, %v320_v57  ;;  %v341_v60 = vadd.f32 %v767_v18, %v319_v58 }
  0xba   : > { %v299_v61 = vpop.permute.xlu1 %298  ;;  %v294_v62 = vpop.permute.xlu0 %293 }
  0xbb   : > { %358 = vst [vmem:[%s773_s5 + $0x68] sm:$0xff] %v342_v59  ;;  %357 = vst [vmem:[%s773_s5 + $0x60] sm:$0xff] %v341_v60  ;;  %v322_v63 = vmul.f32 %v760_v17, %v299_v61  ;;  %v321_v0 = vmul.f32 %v760_v17, %v294_v62 }
  0xbd   : > { %v344_v1 = vadd.f32 %v767_v18, %v322_v63  ;;  %v343_v2 = vadd.f32 %v767_v18, %v321_v0 }
  0xbf   : > { %360 = vst [vmem:[%s773_s5 + $0x78] sm:$0xff] %v344_v1  ;;  %359 = vst [vmem:[%s773_s5 + $0x70] sm:$0xff] %v343_v2 }
  0xc0   : > { %572 = shalt.err (!%p569_p7)
}
  0xc1   : > { %s573_s21 = scalar_lea.hbm %s821_s11, 2048  ;;  %s577_s6 = scalar_lea.hbm %s886_s3, 8192 }
  0xc2   : > { %p574_p9 = scmp.ne.s32.totalorder %s821_s11, %s573_s21  ;;  %p578_p12 = scmp.lt.u32.totalorder %s821_s11, %s886_s3 }
  0xc3   : > { %p579_p13 = scmp.lt.u32.totalorder %s577_s6, %s573_s21  ;;  %p581_p1 = scmp.lt.u32.totalorder %s573_s21, %s821_s11 }
  0xc4   : > { %p575_p10 = pnand %p574_p9, %p730_p3 }
  0xc5   : > { %p580_p0 = por %p579_p13, %p578_p12 }
  0xc6   : > { %p576_p11 = pneg %p575_p10 }
  0xc7   : > { %p582_p2 = por %p581_p1, %p580_p0 }
  0xc9   : > { %p583_p4 = pnand %p582_p2, %p576_p11 }
  0xcb   : > { %586 = shalt.err (!%p583_p4)
}
  0xcc   : > { %s657_s15 = smov 128   ;;  %s658_s9 = smov 8  }
  0xcd   : > { %483 = dma.vmem_to_hbm [thread:$0]  (%p730_p3), %s823_s16, 2048, %s821_s11, %s831_s20, %s657_s15, %s657_s15, %s658_s9  }
  0xce PF: > { %p489_p5 = scmp.ge.s32.totalorder %s653_s19, 2  ;;  %s393_s10 = sand.u32 1, %s625_s12  }
  0xcf   : > { %s394_s24 = scalar_lea.sflag [#allocation3], %s393_s10 }
  0xd0   : > { %p486_p6 = pnand %p489_p5, %p739_p8 }
  0xd2   : > { %620 = dma.done.wait (!%p486_p6), %s394_s24, 2048  }
  0xd3   : > { %622 = vsyncadd (!%p486_p6), %s394_s24, 4294965248  ;;  %s16_s19 = sadd.s32 1, %s653_s19   ;;  %s889_s12 = smov %s629_s13 }
  0xd4   : > { %p13_p7 = scmp.ge.s32.totalorder %s16_s19, 6   ;;  %s890_s13 = smov %s633_s14 }
  0xd5   : > { %s891_s14 = smov %s748_s30  ;;  %s892_s15 = smov %s645_s17 }
  0xd6   : > { %s893_s16 = smov %s649_s18  ;;  %s894_s17 = smov %s897_s22 }
  0xd7   : > { %s895_s18 = smov %s901_s23  ;;  %15 = sbr.rel (!%p13_p7) target bundleno = 5 (0x5), region = 67 }
  0xde   :  { %399 = vsyncpa [#allocation3], 1 }
  0xdf   :  { %401 = vsyncpa [#allocation3 + $0x1], 1 }

</bundles_post_ra>
